<compile_context>
chip_gen: v5e
topology: v5e:2x2
jax: 0.10.0
libtpu: 0.0.40
codegen_flags: <defaults>
</compile_context>

<pallas_src>
import math

import jax
import jax.numpy as jnp
from jax.experimental import pallas as pl
from jax.experimental.pallas import tpu as pltpu

LANE = 128
DEFAULT_TM = 512   # destination-node tile target
DEFAULT_TK = 512   # source-node (reduction) tile target


def _round_up(x, m):
    return ((x + m - 1) // m) * m


# ---------------------------------------------------------------------------
# Projection kernel: xw = x @ W  (lane-dense, out_feat padded to 128)
# ---------------------------------------------------------------------------
def _proj_kernel(x_ref, w_ref, o_ref):
    o_ref[...] = jnp.dot(
        x_ref[...], w_ref[...], preferred_element_type=jnp.float32
    ).astype(o_ref.dtype)


def project(x_pad, w_pad, *, row_tile):
    """(n_src_pad, in_feat) f32 @ (in_feat, out_pad) f32 -> bf16 result."""
    n_src_pad, in_feat = x_pad.shape
    _, out_pad = w_pad.shape
    # TODO(synk): in_feat is kept as a single full block (fine for h_dim=32);
    # a very large in_feat would need an extra reduction grid axis here.
    cost = pl.CostEstimate(
        flops=2 * n_src_pad * in_feat * out_pad,
        transcendentals=0,
        bytes_accessed=(x_pad.size * 4 + w_pad.size * 4
                        + n_src_pad * out_pad * 2),
    )
    return pl.pallas_call(
        _proj_kernel,
        out_shape=jax.ShapeDtypeStruct((n_src_pad, out_pad), jnp.bfloat16),
        grid=(n_src_pad // row_tile,),
        in_specs=[
            pl.BlockSpec((row_tile, in_feat), lambda i: (i, 0)),
            pl.BlockSpec((in_feat, out_pad), lambda i: (0, 0)),
        ],
        out_specs=pl.BlockSpec((row_tile, out_pad), lambda i: (i, 0)),
        compiler_params=pltpu.CompilerParams(
            dimension_semantics=("parallel",),
            vmem_limit_bytes=32 * 1024 * 1024,
        ),
        cost_estimate=cost,
    )(x_pad, w_pad)


# ---------------------------------------------------------------------------
# Fused aggregation kernel:  out = relu( sum_r adj_r @ xw_r )
# grid = (dst_tiles, relations, src_tiles); acc resident across (r, k).
# ---------------------------------------------------------------------------
def _agg_relu_kernel(adj_ref, xw_ref, o_ref, acc_ref):
    r = pl.program_id(1)
    k = pl.program_id(2)

    @pl.when((r == 0) & (k == 0))
    def _():
        acc_ref[...] = jnp.zeros_like(acc_ref)

    acc_ref[...] += jnp.dot(
        adj_ref[...], xw_ref[...], preferred_element_type=jnp.float32
    )

    @pl.when((r == pl.num_programs(1) - 1) & (k == pl.num_programs(2) - 1))
    def _():
        o_ref[...] = jnp.maximum(acc_ref[...], 0.0).astype(o_ref.dtype)


def aggregate_relu(adj_stack, xw_stack, *, tm, tk):
    num_rel, n_dst_pad, n_src_pad = adj_stack.shape
    _, _, out_pad = xw_stack.shape
    cost = pl.CostEstimate(
        flops=2 * num_rel * n_dst_pad * n_src_pad * out_pad,
        transcendentals=0,
        bytes_accessed=(adj_stack.size * 2 + xw_stack.size * 2
                        + n_dst_pad * out_pad * 4),
    )
    return pl.pallas_call(
        _agg_relu_kernel,
        out_shape=jax.ShapeDtypeStruct((n_dst_pad, out_pad), jnp.float32),
        grid_spec=pltpu.PrefetchScalarGridSpec(
            num_scalar_prefetch=0,
            grid=(n_dst_pad // tm, num_rel, n_src_pad // tk),
            in_specs=[
                pl.BlockSpec((None, tm, tk), lambda i, r, k: (r, i, k)),
                pl.BlockSpec((None, tk, out_pad), lambda i, r, k: (r, k, 0)),
            ],
            out_specs=pl.BlockSpec((tm, out_pad), lambda i, r, k: (i, 0)),
            scratch_shapes=[pltpu.VMEM((tm, out_pad), jnp.float32)],
        ),
        compiler_params=pltpu.CompilerParams(
            dimension_semantics=("parallel", "arbitrary", "arbitrary"),
            vmem_limit_bytes=32 * 1024 * 1024,
        ),
        cost_estimate=cost,
    )(adj_stack, xw_stack)


# ---------------------------------------------------------------------------
# Model glue (plain JAX / Python)
# ---------------------------------------------------------------------------
def rel_graph_conv_layer(adjs, x_dict, weights, *,
                         tm_target=DEFAULT_TM, tk_target=DEFAULT_TK):
    """One RelGraphConvLayer forward (relation sum + ReLU fused in-kernel)."""
    out_feat = next(iter(weights.values())).shape[1]
    out_pad = _round_up(out_feat, LANE)

    # Group relations by destination node type.
    groups = {}
    for key in adjs:
        _, _, dtype = key
        groups.setdefault(dtype, []).append(key)

    h_dict = {}
    for ntype, x in x_dict.items():
        n_dst = x.shape[0]
        rel_keys = groups.get(ntype, [])
        if not rel_keys:
            # No incoming relation for this ntype: the PyTorch reference would
            # relu(0); emit an explicit zero matrix of the right shape.
            h_dict[ntype] = jnp.zeros((n_dst, out_feat), jnp.float32)
            continue

        # Destination-node tiling (bf16-friendly sublane multiple of 16).
        n_dst_16 = _round_up(n_dst, 16)
        tm = min(tm_target, n_dst_16)
        n_dst_pad = _round_up(n_dst, tm)

        # Source-node tiling shared by every relation of this group.
        max_src = max(x_dict[s].shape[0] for s, _, _ in rel_keys)
        src_128 = _round_up(max_src, LANE)
        tk = min(tk_target, src_128)
        n_src_pad = _round_up(src_128, tk)

        adj_blocks, xw_blocks = [], []
        for stype, etype, _ in rel_keys:
            adj = adjs[(stype, etype, ntype)]
            n_src = x_dict[stype].shape[0]
            assert adj.shape == (n_dst, n_src), (adj.shape, n_dst, n_src)

            # Zero-pad adjacency (rows -> n_dst_pad, cols -> n_src_pad);
            # values are exactly 0/1 so the bf16 cast is lossless.
            adj_p = jnp.pad(adj, ((0, n_dst_pad - n_dst),
                                  (0, n_src_pad - n_src)))
            adj_blocks.append(adj_p.astype(jnp.bfloat16))

            # Lane-dense projection xw = x @ W (f32 matmul, bf16 result),
            # zero-padded along src rows and output columns.
            x_p = jnp.pad(x_dict[stype], ((0, n_src_pad - n_src), (0, 0)))
            w_p = jnp.pad(weights[etype], ((0, 0), (0, out_pad - out_feat)))
            xw_blocks.append(project(x_p, w_p, row_tile=tk))

        adj_stack = jnp.stack(adj_blocks)   # (R, n_dst_pad, n_src_pad) bf16
        xw_stack = jnp.stack(xw_blocks)     # (R, n_src_pad, out_pad)  bf16

        h_pad = aggregate_relu(adj_stack, xw_stack, tm=tm, tk=tk)
        h_dict[ntype] = h_pad[:n_dst, :out_feat]
    return h_dict


def entity_classify_forward(adjs, embeds, layer_weights):
    h = embeds
    for weights in layer_weights:
        h = rel_graph_conv_layer(adjs, h, weights)
    return h


def xavier_uniform(key, shape, gain):
    fan_in, fan_out = shape
    bound = gain * math.sqrt(6.0 / (fan_in + fan_out))
    return jax.random.uniform(key, shape, jnp.float32, -bound, bound)


# ---------------------------------------------------------------------------
# Reference (pure f32 JAX) for verification
# ---------------------------------------------------------------------------
def ref_layer(adjs, x_dict, weights):
    h_dict = {ntype: None for ntype in x_dict}
    for (stype, etype, dtype), adj in adjs.items():
        m = adj @ (x_dict[stype] @ weights[etype])
        h_dict[dtype] = m if h_dict[dtype] is None else h_dict[dtype] + m
    out = {}
    for nt, h in h_dict.items():
        if h is None:
            out_feat = next(iter(weights.values())).shape[1]
            h = jnp.zeros((x_dict[nt].shape[0], out_feat), jnp.float32)
        out[nt] = jnp.maximum(h, 0.0)
    return out


def ref_forward(adjs, embeds, layer_weights):
    h = embeds
    for weights in layer_weights:
        h = ref_layer(adjs, h, weights)
    return h


if __name__ == "__main__":
    key = jax.random.PRNGKey(0)
    gain = math.sqrt(2.0)  # nn.init.calculate_gain('relu')

    # Small heterogeneous graph.
    ntype_to_num_nodes = {"paper": 256, "author": 128}
    rel_keys = [
        ("author", "writes", "paper"),
        ("paper", "written-by", "author"),
        ("paper", "cites", "paper"),
    ]
    rel_names = sorted({e for _, e, _ in rel_keys})
    h_dim, out_dim = 32, 16

    # Deterministic dense 0/1 adjacency matrices (stand-ins for sparse adjs).
    adjs = {}
    for s, e, d in rel_keys:
        key, sub = jax.random.split(key)
        dense = jax.random.uniform(
            sub, (ntype_to_num_nodes[d], ntype_to_num_nodes[s]), jnp.float32)
        adjs[(s, e, d)] = (dense < 0.1).astype(jnp.float32)  # ~10% density

    # Node embeddings (xavier uniform, relu gain).
    embeds = {}
    for ntype, n in ntype_to_num_nodes.items():
        key, sub = jax.random.split(key)
        embeds[ntype] = xavier_uniform(sub, (n, h_dim), gain)

    # Two RelGraphConvLayer weight sets: (h_dim->h_dim), (h_dim->out_dim).
    layer_weights = []
    for in_f, out_f in [(h_dim, h_dim), (h_dim, out_dim)]:
        w = {}
        for rel in rel_names:
            key, sub = jax.random.split(key)
            w[rel] = xavier_uniform(sub, (in_f, out_f), gain)
        layer_weights.append(w)

    # Run Pallas implementation.
    out = entity_classify_forward(adjs, embeds, layer_weights)
    out = jax.tree_util.tree_map(jax.block_until_ready, out)

    # Verify against pure-f32 JAX reference (bf16 adj/xw path -> loose tol).
    ref = ref_forward(adjs, embeds, layer_weights)
    for ntype in out:
        assert out[ntype].shape == (ntype_to_num_nodes[ntype], out_dim), ntype
        assert jnp.allclose(out[ntype], ref[ntype], atol=1e-1, rtol=5e-2), (
            ntype, float(jnp.max(jnp.abs(out[ntype] - ref[ntype]))))

    print("KERNEL_OK")
</pallas_src>

<mosaic_0001>
module attributes {stable_mosaic.version = 11 : i64} {
  func.func @_proj_kernel(%arg0: i32, %arg1: memref<256x32xf32, #tpu.memory_space<vmem>>, %arg2: memref<32x128xf32, #tpu.memory_space<vmem>>, %arg3: memref<256x128xbf16, #tpu.memory_space<vmem>>) attributes {dimension_semantics = [#tpu.dimension_semantics<parallel>], iteration_bounds = array<i64: 1>, scalar_prefetch = 0 : i64, scratch_operands = 0 : i64, tpu.core_type = #tpu.core_type<tc>, window_params = [{transform_indices = @transform_0, window_bounds = array<i64: 256, 32>}, {pipeline_mode = #tpu.pipeline_mode<synchronous>, transform_indices = @transform_1, window_bounds = array<i64: 32, 128>}, {transform_indices = @transform_2, window_bounds = array<i64: 256, 128>}]} {
    %c0 = arith.constant 0 : index
    %c0_0 = arith.constant 0 : index
    %0 = vector.load %arg1[%c0, %c0_0] : memref<256x32xf32, #tpu.memory_space<vmem>>, vector<256x32xf32>
    %c0_1 = arith.constant 0 : index
    %c0_2 = arith.constant 0 : index
    %1 = vector.load %arg2[%c0_1, %c0_2] : memref<32x128xf32, #tpu.memory_space<vmem>>, vector<32x128xf32>
    %cst = arith.constant dense<0.000000e+00> : vector<256x128xf32>
    %2 = tpu.matmul %0, %1, %cst {dimension_numbers = #tpu.dot_dimension_numbers<[1], [0], [0], [1], [0, 0, 1, 1], [], []>} : vector<256x32xf32>, vector<32x128xf32>, vector<256x128xf32> -> vector<256x128xf32>
    %3 = arith.truncf %2 : vector<256x128xf32> to vector<256x128xbf16>
    %c0_3 = arith.constant 0 : index
    %c0_4 = arith.constant 0 : index
    %4 = vector.load %arg3[%c0_3, %c0_4] : memref<256x128xbf16, #tpu.memory_space<vmem>>, vector<256x128xbf16>
    tpu.vector_store %arg3[%c0_3, %c0_4], %3 {strides = array<i32>} : memref<256x128xbf16, #tpu.memory_space<vmem>>, vector<256x128xbf16>,
    return
  }
  func.func @transform_0(%arg0: i32) -> (i32, i32) {
    %c0_i32 = arith.constant 0 : i32
    %c0_i32_0 = arith.constant 0 : i32
    return %arg0, %c0_i32 : i32, i32
  }
  func.func @transform_1(%arg0: i32) -> (i32, i32) {
    %c0_i32 = arith.constant 0 : i32
    %c0_i32_0 = arith.constant 0 : i32
    %c0_i32_1 = arith.constant 0 : i32
    return %c0_i32, %c0_i32_0 : i32, i32
  }
  func.func @transform_2(%arg0: i32) -> (i32, i32) {
    %c0_i32 = arith.constant 0 : i32
    %c0_i32_0 = arith.constant 0 : i32
    return %arg0, %c0_i32 : i32, i32
  }
}

</mosaic_0001>

<bundles_post_ra>
// kernel: tpu_custom_call.1
= control target key start
LH: loop header
LB: loop body
LE: loop exit
PB: predicated region body
PF: predicated region fallthrough
CT: control target
= control target key end

     0   :  { %vm48_vm0 = vcmask 261120   ;;  %s669_s0 = inlined_call_operand.vmem [shape: f32[256,32], index: 0, kind: input, shape index: {}]   ;;  %s670_s1 = inlined_call_operand.vmem [shape: f32[32,128], index: 1, kind: input, shape index: {}]   ;;  %s671_s2 = inlined_call_operand.hbm [shape: bf16[256,128], index: 2, kind: output, shape index: {}]  }
   0x1   :  { %v47_v0 = vld [vmem:[%s670_s1 + $0x18] sm:$0xff]  ;;  %v46_v1 = vld [vmem:[%s670_s1 + $0x10] sm:$0xff]  ;;  %v45_v2 = vld [vmem:[%s670_s1 + $0x8] sm:$0xff] }
   0x2   :  { %157 = vmatpush.msra.mxu0 %v47_v0  ;;  %467 = vmatpush.msra.mxu1 %v47_v0  ;;  %v44_v3 = vld [vmem:[%s670_s1] sm:$0xff] }
   0x3   :  { %468 = vmatpush.msra.mxu2 %v47_v0  ;;  %469 = vmatpush.msra.mxu3 %v47_v0  ;;  %v12_v4 = vld [vmem:[%s669_s0] sm:$0xff] }
   0x4   :  { %158 = vmatpush.msra.mxu0 %v46_v1  ;;  %470 = vmatpush.msra.mxu1 %v46_v1  ;;  %v20_v5 = vld [vmem:[%s669_s0 + $0x40] sm:$0xff] }
   0x5   :  { %471 = vmatpush.msra.mxu2 %v46_v1  ;;  %472 = vmatpush.msra.mxu3 %v46_v1  ;;  %v28_v6 = vld [vmem:[%s669_s0 + $0x80] sm:$0xff] }
   0x6   :  { %159 = vmatpush.msra.mxu0 %v45_v2  ;;  %473 = vmatpush.msra.mxu1 %v45_v2  ;;  %v36_v7 = vld [vmem:[%s669_s0 + $0xc0] sm:$0xff] }
   0x7   :  { %474 = vmatpush.msra.mxu2 %v45_v2  ;;  %475 = vmatpush.msra.mxu3 %v45_v2 }
   0x8   :  { %160 = vmatpush.msra.mxu0 %v44_v3  ;;  %476 = vmatpush.msra.mxu1 %v44_v3 }
   0x9   :  { %7 = vsyncpa [#allocation3], 0  ;;  %477 = vmatpush.msra.mxu2 %v44_v3  ;;  %478 = vmatpush.msra.mxu3 %v44_v3  ;;  %v13_v8 = vld [vmem:[%s669_s0 + $0x8] sm:$0xff]  ;;  %v14_v12 = vld [vmem:[%s669_s0 + $0x10] sm:$0xff]  ;;  %s328_s25 = sshll.u32 %s671_s2, 4  ;;  %s509_s26 = smov 64   ;;  %s329_s25 = int_to_ptr.hbm [resolvable:$true] %s328_s25 }
   0xa   :  { %340 = vmatmul.msk.f32.vlgmr.msra.gmra.mxu0 %vm48_vm0, %v12_v4  ;;  %348 = vmatmul.msk.f32.vlgmr.msra.gmra.mxu1 %vm48_vm0, %v20_v5  ;;  %v21_v9 = vld [vmem:[%s669_s0 + $0x48] sm:$0xff]  ;;  %v22_v13 = vld [vmem:[%s669_s0 + $0x50] sm:$0xff]  ;;  %v15_v16 = vld [vmem:[%s669_s0 + $0x18] sm:$0xff]  ;;  %s510_s27 = smov 4  }
   0xb   :  { %356 = vmatmul.msk.f32.vlgmr.msra.gmra.mxu2 %vm48_vm0, %v28_v6  ;;  %364 = vmatmul.msk.f32.vlgmr.msra.gmra.mxu3 %vm48_vm0, %v36_v7  ;;  %v29_v10 = vld [vmem:[%s669_s0 + $0x88] sm:$0xff]  ;;  %v30_v14 = vld [vmem:[%s669_s0 + $0x90] sm:$0xff]  ;;  %v23_v17 = vld [vmem:[%s669_s0 + $0x58] sm:$0xff] }
   0xc   :  { %v37_v11 = vld [vmem:[%s669_s0 + $0xc8] sm:$0xff]  ;;  %v38_v15 = vld [vmem:[%s669_s0 + $0xd0] sm:$0xff]  ;;  %v31_v18 = vld [vmem:[%s669_s0 + $0x98] sm:$0xff] }
   0xd   :  { %v39_v19 = vld [vmem:[%s669_s0 + $0xd8] sm:$0xff]  ;;  %v16_v20 = vld [vmem:[%s669_s0 + $0x20] sm:$0xff]  ;;  %v17_v24 = vld [vmem:[%s669_s0 + $0x28] sm:$0xff] }
   0xe   :  { %v24_v21 = vld [vmem:[%s669_s0 + $0x60] sm:$0xff]  ;;  %v25_v25 = vld [vmem:[%s669_s0 + $0x68] sm:$0xff]  ;;  %v18_v28 = vld [vmem:[%s669_s0 + $0x30] sm:$0xff] }
   0xf   :  { %v32_v22 = vld [vmem:[%s669_s0 + $0xa0] sm:$0xff]  ;;  %v33_v26 = vld [vmem:[%s669_s0 + $0xa8] sm:$0xff]  ;;  %v26_v29 = vld [vmem:[%s669_s0 + $0x70] sm:$0xff] }
  0x10   :  { %v40_v23 = vld [vmem:[%s669_s0 + $0xe0] sm:$0xff]  ;;  %v41_v27 = vld [vmem:[%s669_s0 + $0xe8] sm:$0xff]  ;;  %v34_v30 = vld [vmem:[%s669_s0 + $0xb0] sm:$0xff] }
  0x11   :  { %v42_v31 = vld [vmem:[%s669_s0 + $0xf0] sm:$0xff]  ;;  %v19_v32 = vld [vmem:[%s669_s0 + $0x38] sm:$0xff] }
  0x12   :  { %341 = vmatmul.msk.f32.gmra.mxu0 %vm48_vm0, %v13_v8  ;;  %349 = vmatmul.msk.f32.gmra.mxu1 %vm48_vm0, %v21_v9  ;;  %v27_v33 = vld [vmem:[%s669_s0 + $0x78] sm:$0xff] }
  0x13   :  { %357 = vmatmul.msk.f32.gmra.mxu2 %vm48_vm0, %v29_v10  ;;  %365 = vmatmul.msk.f32.gmra.mxu3 %vm48_vm0, %v37_v11  ;;  %v35_v34 = vld [vmem:[%s669_s0 + $0xb8] sm:$0xff] }
  0x14   :  { %v43_v35 = vld [vmem:[%s669_s0 + $0xf8] sm:$0xff]  ;;  %s508_s0 = smov [#allocation2]  }
  0x15   :  { %s326_s1 = sshll.u32 %s508_s0, 4  ;;  %s327_s1 = int_to_ptr.vmem [resolvable:$true] %s326_s1 }
  0x1a   :  { %342 = vmatmul.msk.f32.gmra.mxu0 %vm48_vm0, %v14_v12  ;;  %350 = vmatmul.msk.f32.gmra.mxu1 %vm48_vm0, %v22_v13 }
  0x1b   :  { %358 = vmatmul.msk.f32.gmra.mxu2 %vm48_vm0, %v30_v14  ;;  %366 = vmatmul.msk.f32.gmra.mxu3 %vm48_vm0, %v38_v15 }
  0x22   :  { %343 = vmatmul.msk.f32.gmra.mxu0 %vm48_vm0, %v15_v16  ;;  %351 = vmatmul.msk.f32.gmra.mxu1 %vm48_vm0, %v23_v17 }
  0x23   :  { %359 = vmatmul.msk.f32.gmra.mxu2 %vm48_vm0, %v31_v18  ;;  %367 = vmatmul.msk.f32.gmra.mxu3 %vm48_vm0, %v39_v19 }
  0x2a   :  { %344 = vmatmul.msk.f32.gmra.mxu0 %vm48_vm0, %v16_v20  ;;  %352 = vmatmul.msk.f32.gmra.mxu1 %vm48_vm0, %v24_v21 }
  0x2b   :  { %360 = vmatmul.msk.f32.gmra.mxu2 %vm48_vm0, %v32_v22  ;;  %368 = vmatmul.msk.f32.gmra.mxu3 %vm48_vm0, %v40_v23 }
  0x32   :  { %345 = vmatmul.msk.f32.gmra.mxu0 %vm48_vm0, %v17_v24  ;;  %353 = vmatmul.msk.f32.gmra.mxu1 %vm48_vm0, %v25_v25 }
  0x33   :  { %361 = vmatmul.msk.f32.gmra.mxu2 %vm48_vm0, %v33_v26  ;;  %369 = vmatmul.msk.f32.gmra.mxu3 %vm48_vm0, %v41_v27 }
  0x3a   :  { %346 = vmatmul.msk.f32.gmra.mxu0 %vm48_vm0, %v18_v28  ;;  %354 = vmatmul.msk.f32.gmra.mxu1 %vm48_vm0, %v26_v29 }
  0x3b   :  { %362 = vmatmul.msk.f32.gmra.mxu2 %vm48_vm0, %v34_v30  ;;  %370 = vmatmul.msk.f32.gmra.mxu3 %vm48_vm0, %v42_v31 }
  0x42   :  { %347 = vmatmul.msk.f32.gmra.mxu0 %vm48_vm0, %v19_v32  ;;  %355 = vmatmul.msk.f32.gmra.mxu1 %vm48_vm0, %v27_v33 }
  0x43   :  { %363 = vmatmul.msk.f32.gmra.mxu2 %vm48_vm0, %v35_v34  ;;  %371 = vmatmul.msk.f32.gmra.mxu3 %vm48_vm0, %v43_v35 }
  0x87   :  { %v162_v36 = vpop.f32.mrf.mxu0  ;;  %v186_v37 = vpop.f32.mrf.mxu1 }
  0x8e   :  { %v210_v38 = vpop.f32.mrf.mxu2  ;;  %v234_v39 = vpop.f32.mrf.mxu3 }
  0x8f   :  { %v165_v40 = vpop.f32.mrf.mxu0  ;;  %v189_v41 = vpop.f32.mrf.mxu1 }
  0x90   :  { %v375_v42 = vpack.c.bf16 %v165_v40, %v162_v36  ;;  %v395_v43 = vpack.c.bf16 %v189_v41, %v186_v37 }
  0x92   :  { %376 = vst [vmem:[#allocation2] sm:$0xff] %v375_v42  }
  0x93   :  { %455 = vst [vmem:[#allocation2 + $0x20] sm:$0xff] %v395_v43  }
  0x96   :  { %v213_v44 = vpop.f32.mrf.mxu2  ;;  %v237_v45 = vpop.f32.mrf.mxu3 }
  0x97   :  { %v415_v46 = vpack.c.bf16 %v213_v44, %v210_v38  ;;  %v435_v47 = vpack.c.bf16 %v237_v45, %v234_v39  ;;  %v168_v48 = vpop.f32.mrf.mxu0  ;;  %v192_v49 = vpop.f32.mrf.mxu1 }
  0x99   :  { %459 = vst [vmem:[#allocation2 + $0x40] sm:$0xff] %v415_v46  }
  0x9a   :  { %463 = vst [vmem:[#allocation2 + $0x60] sm:$0xff] %v435_v47  }
  0x9e   :  { %v216_v50 = vpop.f32.mrf.mxu2  ;;  %v240_v51 = vpop.f32.mrf.mxu3 }
  0x9f   :  { %v171_v52 = vpop.f32.mrf.mxu0  ;;  %v195_v53 = vpop.f32.mrf.mxu1 }
  0xa0   :  { %v380_v54 = vpack.c.bf16 %v171_v52, %v168_v48  ;;  %v400_v55 = vpack.c.bf16 %v195_v53, %v192_v49 }
  0xa2   :  { %452 = vst [vmem:[#allocation2 + $0x8] sm:$0xff] %v380_v54  }
  0xa3   :  { %456 = vst [vmem:[#allocation2 + $0x28] sm:$0xff] %v400_v55  }
  0xa6   :  { %v219_v56 = vpop.f32.mrf.mxu2  ;;  %v243_v57 = vpop.f32.mrf.mxu3 }
  0xa7   :  { %v420_v58 = vpack.c.bf16 %v219_v56, %v216_v50  ;;  %v440_v59 = vpack.c.bf16 %v243_v57, %v240_v51  ;;  %v174_v60 = vpop.f32.mrf.mxu0  ;;  %v198_v61 = vpop.f32.mrf.mxu1 }
  0xa9   :  { %460 = vst [vmem:[#allocation2 + $0x48] sm:$0xff] %v420_v58  }
  0xaa   :  { %464 = vst [vmem:[#allocation2 + $0x68] sm:$0xff] %v440_v59  }
  0xae   :  { %v222_v62 = vpop.f32.mrf.mxu2  ;;  %v246_v63 = vpop.f32.mrf.mxu3 }
  0xaf   :  { %v177_v0 = vpop.f32.mrf.mxu0  ;;  %v201_v1 = vpop.f32.mrf.mxu1 }
  0xb0   :  { %v385_v2 = vpack.c.bf16 %v177_v0, %v174_v60  ;;  %v405_v3 = vpack.c.bf16 %v201_v1, %v198_v61 }
  0xb2   :  { %453 = vst [vmem:[#allocation2 + $0x10] sm:$0xff] %v385_v2  }
  0xb3   :  { %457 = vst [vmem:[#allocation2 + $0x30] sm:$0xff] %v405_v3  }
  0xb6   :  { %v225_v4 = vpop.f32.mrf.mxu2  ;;  %v249_v5 = vpop.f32.mrf.mxu3 }
  0xb7   :  { %v425_v6 = vpack.c.bf16 %v225_v4, %v222_v62  ;;  %v445_v7 = vpack.c.bf16 %v249_v5, %v246_v63  ;;  %v180_v8 = vpop.f32.mrf.mxu0  ;;  %v204_v9 = vpop.f32.mrf.mxu1 }
  0xb9   :  { %461 = vst [vmem:[#allocation2 + $0x50] sm:$0xff] %v425_v6  }
  0xba   :  { %465 = vst [vmem:[#allocation2 + $0x70] sm:$0xff] %v445_v7  }
  0xbe   :  { %v228_v10 = vpop.f32.mrf.mxu2  ;;  %v252_v11 = vpop.f32.mrf.mxu3 }
  0xbf   :  { %v183_v12 = vpop.f32.mrf.mxu0  ;;  %v207_v13 = vpop.f32.mrf.mxu1 }
  0xc0   :  { %v390_v14 = vpack.c.bf16 %v183_v12, %v180_v8  ;;  %v410_v15 = vpack.c.bf16 %v207_v13, %v204_v9 }
  0xc2   :  { %454 = vst [vmem:[#allocation2 + $0x18] sm:$0xff] %v390_v14  }
  0xc3   :  { %458 = vst [vmem:[#allocation2 + $0x38] sm:$0xff] %v410_v15  }
  0xc6   :  { %v231_v16 = vpop.f32.mrf.mxu2  ;;  %v255_v17 = vpop.f32.mrf.mxu3 }
  0xc7   :  { %v430_v18 = vpack.c.bf16 %v231_v16, %v228_v10  ;;  %v450_v19 = vpack.c.bf16 %v255_v17, %v252_v11 }
  0xc9   :  { %462 = vst [vmem:[#allocation2 + $0x58] sm:$0xff] %v430_v18  }
  0xca   :  { %466 = vst [vmem:[#allocation2 + $0x78] sm:$0xff] %v450_v19  }
  0xcb   :  { %334 = dma.vmem_to_hbm [thread:$0]  %s327_s1, 2048, %s329_s25, [#allocation3], %s509_s26, %s509_s26, %s510_s27  }
  0xcc   :  { %506 = dma.done.wait [#allocation3], 2048  }
  0xcd   :  { %507 = vsyncadd [#allocation3], 4294965248 }
  0xce   :  { %339 = vsyncpa [#allocation3], 1 }

</bundles_post_ra>
